<compile_context>
chip_gen: v7x
topology: tpu7x:2x2x1
jax: 0.10.0
libtpu: 0.0.40
codegen_flags: <defaults>
</compile_context>

<pallas_src>
import math

import jax
import jax.numpy as jnp
from jax.experimental import pallas as pl
from jax.experimental.pallas import tpu as pltpu


def _round_up(n, m):
    return -(-n // m) * m


# ----------------------------------------------------------------------------
# Kernel
# ----------------------------------------------------------------------------
def _vae_rbf_forward(x, eps, w_ref, b_ref, dims,
                     out_ref, z_ref, mean_ref, var_ref, log_var_ref):
    """One VAErbf forward pass. Weights are (in, out); all matmuls are [M,K]x[K,N]."""
    D_in, H, L, D_out = dims["D_in"], dims["H"], dims["L"], dims["D_out"]
    o1, omv, o3, o4 = dims["off_w1"], dims["off_wmv"], dims["off_w3"], dims["off_w4"]

    # Static slices into the packed weight / bias slabs (resolved at trace time).
    w1 = w_ref[o1:o1 + D_in, 0:H]           # (D_in, H)
    wmv = w_ref[omv:omv + H, 0:2 * L]       # (H, 2L) == [Wm.T | Wv.T]
    w3 = w_ref[o3:o3 + L, 0:H]              # (L, H)
    w4 = w_ref[o4:o4 + H, 0:D_out]          # (H, D_out)

    b1 = b_ref[0:1, 0:H]
    bmv = b_ref[1:2, 0:2 * L]               # [bm | bv]
    b3 = b_ref[2:3, 0:H]
    b4 = b_ref[3:4, 0:D_out]

    # ---- encoder: Linear + Gaussian RBF activation phi(u) = exp(-u^2) ----
    h = jnp.dot(x, w1, preferred_element_type=jnp.float32) + b1
    h = jnp.exp(-(h * h))

    # ---- latent heads (mean / log_var fused into one matmul) ----
    hmv = jnp.dot(h, wmv, preferred_element_type=jnp.float32) + bmv
    mean = hmv[:, 0:L]
    log_var = hmv[:, L:2 * L]
    std = jnp.exp(0.5 * log_var)
    var = std * std                          # == exp(log_var), one fewer EUP exp

    # ---- reparameterization ----
    z = mean + std * eps

    # ---- decoder: Linear + RBF + Linear + sigmoid ----
    hd = jnp.dot(z, w3, preferred_element_type=jnp.float32) + b3
    hd = jnp.exp(-(hd * hd))
    logits = jnp.dot(hd, w4, preferred_element_type=jnp.float32) + b4

    out_ref[...] = jax.nn.sigmoid(logits)
    z_ref[...] = z
    mean_ref[...] = mean
    var_ref[...] = var
    log_var_ref[...] = log_var


def _make_cor_vae_kernel(dims_x, dims_y):
    def kernel(x_ref, eps_x_ref, wx_ref, bx_ref,
               y_ref, eps_y_ref, wy_ref, by_ref,
               out_x_ref, z_x_ref, mean_x_ref, var_x_ref, log_var_x_ref,
               out_y_ref, z_y_ref, mean_y_ref, var_y_ref, log_var_y_ref):
        _vae_rbf_forward(x_ref[...], eps_x_ref[...], wx_ref, bx_ref, dims_x,
                         out_x_ref, z_x_ref, mean_x_ref, var_x_ref, log_var_x_ref)
        _vae_rbf_forward(y_ref[...], eps_y_ref[...], wy_ref, by_ref, dims_y,
                         out_y_ref, z_y_ref, mean_y_ref, var_y_ref, log_var_y_ref)
    return kernel


# ----------------------------------------------------------------------------
# One-time, host-side parameter packing (do NOT repeat per forward call)
# ----------------------------------------------------------------------------
def prepare_vae_params(params):
    """Transpose weights to (in, out) and pack everything into one weight slab
    plus one bias slab per VAE (2 input DMAs per VAE)."""
    w1t = jnp.asarray(params["W1"], jnp.float32).T                     # (D_in, H)
    wmvt = jnp.concatenate(
        [jnp.asarray(params["Wm"], jnp.float32).T,
         jnp.asarray(params["Wv"], jnp.float32).T], axis=1)            # (H, 2L)
    w3t = jnp.asarray(params["W3"], jnp.float32).T                     # (L, H)
    w4t = jnp.asarray(params["W4"], jnp.float32).T                     # (H, D_out)

    D_in, H = w1t.shape
    L = w3t.shape[0]
    D_out = w4t.shape[1]

    mats = (w1t, wmvt, w3t, w4t)
    cols = max(m.shape[1] for m in mats)
    offs, cur = [], 0
    for m in mats:
        offs.append(cur)
        cur += _round_up(m.shape[0], 8)      # keep every block sublane-aligned
    wslab = jnp.zeros((cur, cols), jnp.float32)
    for m, o in zip(mats, offs):
        wslab = wslab.at[o:o + m.shape[0], 0:m.shape[1]].set(m)

    bcols = max(H, 2 * L, D_out)
    bslab = jnp.zeros((8, bcols), jnp.float32)
    bslab = bslab.at[0, 0:H].set(jnp.asarray(params["b1"], jnp.float32))
    bslab = bslab.at[1, 0:2 * L].set(jnp.concatenate(
        [jnp.asarray(params["bm"], jnp.float32),
         jnp.asarray(params["bv"], jnp.float32)]))
    bslab = bslab.at[2, 0:H].set(jnp.asarray(params["b3"], jnp.float32))
    bslab = bslab.at[3, 0:D_out].set(jnp.asarray(params["b4"], jnp.float32))

    dims = dict(D_in=D_in, H=H, L=L, D_out=D_out,
                off_w1=offs[0], off_wmv=offs[1], off_w3=offs[2], off_w4=offs[3])
    return dict(wslab=wslab, bslab=bslab, dims=dims)


def prepare_cor_vae_params(params_x, params_y):
    return prepare_vae_params(params_x), prepare_vae_params(params_y)


# ----------------------------------------------------------------------------
# Forward wrapper
# ----------------------------------------------------------------------------
def cor_vae_rbf_forward(x, y, eps_x, eps_y, prepared):
    px, py = prepared
    dx, dy = px["dims"], py["dims"]
    B = x.shape[0]

    out_shape = (
        jax.ShapeDtypeStruct((B, dx["D_out"]), jnp.float32),   # output_x
        jax.ShapeDtypeStruct((B, dx["L"]), jnp.float32),       # z_x
        jax.ShapeDtypeStruct((B, dx["L"]), jnp.float32),       # mean_x
        jax.ShapeDtypeStruct((B, dx["L"]), jnp.float32),       # var_x
        jax.ShapeDtypeStruct((B, dx["L"]), jnp.float32),       # log_var_x
        jax.ShapeDtypeStruct((B, dy["D_out"]), jnp.float32),   # output_y
        jax.ShapeDtypeStruct((B, dy["L"]), jnp.float32),       # z_y
        jax.ShapeDtypeStruct((B, dy["L"]), jnp.float32),       # mean_y
        jax.ShapeDtypeStruct((B, dy["L"]), jnp.float32),       # var_y
        jax.ShapeDtypeStruct((B, dy["L"]), jnp.float32),       # log_var_y
    )

    inputs = (x, eps_x, px["wslab"], px["bslab"],
              y, eps_y, py["wslab"], py["bslab"])

    vmem_spec = pl.BlockSpec(memory_space=pltpu.MemorySpace.VMEM)

    flops = 2 * B * (dx["D_in"] * dx["H"] + 2 * dx["H"] * dx["L"]
                     + dx["L"] * dx["H"] + dx["H"] * dx["D_out"]
                     + dy["D_in"] * dy["H"] + 2 * dy["H"] * dy["L"]
                     + dy["L"] * dy["H"] + dy["H"] * dy["D_out"])
    transcendentals = B * (2 * dx["H"] + dx["L"] + dx["D_out"]
                           + 2 * dy["H"] + dy["L"] + dy["D_out"])
    bytes_accessed = 4 * (sum(int(a.size) for a in inputs)
                          + sum(math.prod(s.shape) for s in out_shape))

    fwd = pl.pallas_call(
        _make_cor_vae_kernel(dx, dy),
        out_shape=out_shape,
        in_specs=[vmem_spec] * len(inputs),
        out_specs=tuple(vmem_spec for _ in out_shape),
        compiler_params=pltpu.CompilerParams(vmem_limit_bytes=32 * 1024 * 1024),
        cost_estimate=pl.CostEstimate(flops=flops,
                                      transcendentals=transcendentals,
                                      bytes_accessed=bytes_accessed),
    )
    return fwd(*inputs)


# ----------------------------------------------------------------------------
# Pure-JAX reference (mirrors the assumed PyTorch VAErbf forward)
# ----------------------------------------------------------------------------
def vae_rbf_reference(x, eps, params):
    def lin(a, w, b):
        return jnp.dot(a, jnp.asarray(w).T,
                       precision=jax.lax.Precision.HIGHEST) + jnp.asarray(b)
    h = jnp.exp(-jnp.square(lin(x, params["W1"], params["b1"])))
    mean = lin(h, params["Wm"], params["bm"])
    log_var = lin(h, params["Wv"], params["bv"])
    std = jnp.exp(0.5 * log_var)
    var = jnp.exp(log_var)
    z = mean + std * eps
    hd = jnp.exp(-jnp.square(lin(z, params["W3"], params["b3"])))
    out = jax.nn.sigmoid(lin(hd, params["W4"], params["b4"]))
    return out, z, mean, var, log_var


# ----------------------------------------------------------------------------
# Deterministic synthetic parameter init (shapes from VAErbf __init__)
# ----------------------------------------------------------------------------
def init_vae_params(key, input_dim, hidden_dim, latent_dim):
    ks = jax.random.split(key, 10)
    scale = 0.05
    return {
        "W1": scale * jax.random.normal(ks[0], (hidden_dim, input_dim), jnp.float32),
        "b1": scale * jax.random.normal(ks[1], (hidden_dim,), jnp.float32),
        "Wm": scale * jax.random.normal(ks[2], (latent_dim, hidden_dim), jnp.float32),
        "bm": scale * jax.random.normal(ks[3], (latent_dim,), jnp.float32),
        "Wv": scale * jax.random.normal(ks[4], (latent_dim, hidden_dim), jnp.float32),
        "bv": scale * jax.random.normal(ks[5], (latent_dim,), jnp.float32),
        "W3": scale * jax.random.normal(ks[6], (hidden_dim, latent_dim), jnp.float32),
        "b3": scale * jax.random.normal(ks[7], (hidden_dim,), jnp.float32),
        "W4": scale * jax.random.normal(ks[8], (input_dim, hidden_dim), jnp.float32),
        "b4": scale * jax.random.normal(ks[9], (input_dim,), jnp.float32),
    }


if __name__ == "__main__":
    # Small shapes consistent with the module's constructor; x and y dims
    # deliberately differ to exercise the general (non-matching) case.
    B = 8
    input_dim_x, hidden_dim_x, latent_dim_x = 16, 32, 8
    input_dim_y, hidden_dim_y, latent_dim_y = 24, 40, 12

    root = jax.random.PRNGKey(0)
    k_px, k_py, k_x, k_y, k_ex, k_ey = jax.random.split(root, 6)

    params_x = init_vae_params(k_px, input_dim_x, hidden_dim_x, latent_dim_x)
    params_y = init_vae_params(k_py, input_dim_y, hidden_dim_y, latent_dim_y)
    prepared = prepare_cor_vae_params(params_x, params_y)   # one-time packing

    x = jax.random.normal(k_x, (B, input_dim_x), jnp.float32)
    y = jax.random.normal(k_y, (B, input_dim_y), jnp.float32)
    # reparameterization noise (torch.randn_like equivalent), host-generated
    eps_x = jax.random.normal(k_ex, (B, latent_dim_x), jnp.float32)
    eps_y = jax.random.normal(k_ey, (B, latent_dim_y), jnp.float32)

    outs = cor_vae_rbf_forward(x, y, eps_x, eps_y, prepared)
    outs = jax.block_until_ready(outs)

    refs = (vae_rbf_reference(x, eps_x, params_x)
            + vae_rbf_reference(y, eps_y, params_y))
    names = ("output_x", "z_x", "mean_x", "var_x", "log_var_x",
             "output_y", "z_y", "mean_y", "var_y", "log_var_y")
    # Loose tolerance: the XLA reference and the in-kernel MXU matmuls may use
    # different f32 matmul precision paths; real structural bugs are O(1) off.
    for name, got, want in zip(names, outs, refs):
        assert got.shape == want.shape, (name, got.shape, want.shape)
        assert bool(jnp.allclose(got, want, rtol=1e-2, atol=1e-2)), name

    # tight internal consistency checks
    (output_x, z_x, mean_x, var_x, log_var_x,
     output_y, z_y, mean_y, var_y, log_var_y) = outs
    assert bool(jnp.allclose(var_x, jnp.exp(log_var_x), rtol=1e-5, atol=1e-6))
    assert bool(jnp.allclose(var_y, jnp.exp(log_var_y), rtol=1e-5, atol=1e-6))
    assert bool(jnp.allclose(z_x, mean_x + jnp.exp(0.5 * log_var_x) * eps_x,
                             rtol=1e-5, atol=1e-6))
    assert bool(jnp.allclose(z_y, mean_y + jnp.exp(0.5 * log_var_y) * eps_y,
                             rtol=1e-5, atol=1e-6))

    print("KERNEL_OK")
</pallas_src>

<mosaic_0001>
module attributes {stable_mosaic.version = 11 : i64} {
  func.func @kernel(%arg0: memref<8x16xf32, #tpu.memory_space<vmem>>, %arg1: memref<8x8xf32, #tpu.memory_space<vmem>>, %arg2: memref<88x32xf32, #tpu.memory_space<vmem>>, %arg3: memref<8x32xf32, #tpu.memory_space<vmem>>, %arg4: memref<8x24xf32, #tpu.memory_space<vmem>>, %arg5: memref<8x12xf32, #tpu.memory_space<vmem>>, %arg6: memref<120x40xf32, #tpu.memory_space<vmem>>, %arg7: memref<8x40xf32, #tpu.memory_space<vmem>>, %arg8: memref<8x16xf32, #tpu.memory_space<vmem>>, %arg9: memref<8x8xf32, #tpu.memory_space<vmem>>, %arg10: memref<8x8xf32, #tpu.memory_space<vmem>>, %arg11: memref<8x8xf32, #tpu.memory_space<vmem>>, %arg12: memref<8x8xf32, #tpu.memory_space<vmem>>, %arg13: memref<8x24xf32, #tpu.memory_space<vmem>>, %arg14: memref<8x12xf32, #tpu.memory_space<vmem>>, %arg15: memref<8x12xf32, #tpu.memory_space<vmem>>, %arg16: memref<8x12xf32, #tpu.memory_space<vmem>>, %arg17: memref<8x12xf32, #tpu.memory_space<vmem>>) attributes {dimension_semantics = [], scalar_prefetch = 0 : i64, scratch_operands = 0 : i64, tpu.core_type = #tpu.core_type<tc>} {
    %c0 = arith.constant 0 : index
    %c0_0 = arith.constant 0 : index
    %0 = vector.load %arg0[%c0, %c0_0] : memref<8x16xf32, #tpu.memory_space<vmem>>, vector<8x16xf32>
    %c0_1 = arith.constant 0 : index
    %c0_2 = arith.constant 0 : index
    %1 = vector.load %arg1[%c0_1, %c0_2] : memref<8x8xf32, #tpu.memory_space<vmem>>, vector<8x8xf32>
    %c0_3 = arith.constant 0 : index
    %c0_4 = arith.constant 0 : index
    %2 = vector.load %arg2[%c0_3, %c0_4] : memref<88x32xf32, #tpu.memory_space<vmem>>, vector<16x32xf32>
    %c16 = arith.constant 16 : index
    %c0_5 = arith.constant 0 : index
    %3 = vector.load %arg2[%c16, %c0_5] : memref<88x32xf32, #tpu.memory_space<vmem>>, vector<32x16xf32>
    %c48 = arith.constant 48 : index
    %c0_6 = arith.constant 0 : index
    %4 = vector.load %arg2[%c48, %c0_6] : memref<88x32xf32, #tpu.memory_space<vmem>>, vector<8x32xf32>
    %c56 = arith.constant 56 : index
    %c0_7 = arith.constant 0 : index
    %5 = vector.load %arg2[%c56, %c0_7] : memref<88x32xf32, #tpu.memory_space<vmem>>, vector<32x16xf32>
    %c0_8 = arith.constant 0 : index
    %c0_9 = arith.constant 0 : index
    %6 = vector.load %arg3[%c0_8, %c0_9] : memref<8x32xf32, #tpu.memory_space<vmem>>, vector<1x32xf32>
    %c1 = arith.constant 1 : index
    %c0_10 = arith.constant 0 : index
    %7 = vector.load %arg3[%c1, %c0_10] : memref<8x32xf32, #tpu.memory_space<vmem>>, vector<1x16xf32>
    %c2 = arith.constant 2 : index
    %c0_11 = arith.constant 0 : index
    %8 = vector.load %arg3[%c2, %c0_11] : memref<8x32xf32, #tpu.memory_space<vmem>>, vector<1x32xf32>
    %c3 = arith.constant 3 : index
    %c0_12 = arith.constant 0 : index
    %9 = vector.load %arg3[%c3, %c0_12] : memref<8x32xf32, #tpu.memory_space<vmem>>, vector<1x16xf32>
    %cst = arith.constant dense<0.000000e+00> : vector<8x32xf32>
    %10 = tpu.matmul %0, %2, %cst {dimension_numbers = #tpu.dot_dimension_numbers<[1], [0], [0], [1], [0, 0, 1, 1], [], []>} : vector<8x16xf32>, vector<16x32xf32>, vector<8x32xf32> -> vector<8x32xf32>
    %11 = vector.broadcast %6 : vector<1x32xf32> to vector<8x32xf32>
    %12 = arith.addf %10, %11 : vector<8x32xf32>
    %13 = arith.mulf %12, %12 : vector<8x32xf32>
    %cst_13 = arith.constant 0.000000e+00 : f32
    %14 = vector.broadcast %cst_13 : f32 to vector<8x32xf32>
    %15 = arith.subf %14, %13 : vector<8x32xf32>
    %16 = math.exp %15 : vector<8x32xf32>
    %cst_14 = arith.constant dense<0.000000e+00> : vector<8x16xf32>
    %17 = tpu.matmul %16, %3, %cst_14 {dimension_numbers = #tpu.dot_dimension_numbers<[1], [0], [0], [1], [0, 0, 1, 1], [], []>} : vector<8x32xf32>, vector<32x16xf32>, vector<8x16xf32> -> vector<8x16xf32>
    %18 = vector.broadcast %7 : vector<1x16xf32> to vector<8x16xf32>
    %19 = arith.addf %17, %18 : vector<8x16xf32>
    %20 = vector.extract_strided_slice %19 {offsets = [0, 0], sizes = [8, 8], strides = [1, 1]} : vector<8x16xf32> to vector<8x8xf32>
    %21 = vector.extract_strided_slice %19 {offsets = [0, 8], sizes = [8, 8], strides = [1, 1]} : vector<8x16xf32> to vector<8x8xf32>
    %cst_15 = arith.constant 5.000000e-01 : f32
    %22 = vector.broadcast %cst_15 : f32 to vector<8x8xf32>
    %23 = arith.mulf %22, %21 : vector<8x8xf32>
    %24 = math.exp %23 : vector<8x8xf32>
    %25 = arith.mulf %24, %24 : vector<8x8xf32>
    %26 = arith.mulf %24, %1 : vector<8x8xf32>
    %27 = arith.addf %20, %26 : vector<8x8xf32>
    %cst_16 = arith.constant dense<0.000000e+00> : vector<8x32xf32>
    %28 = tpu.matmul %27, %4, %cst_16 {dimension_numbers = #tpu.dot_dimension_numbers<[1], [0], [0], [1], [0, 0, 1, 1], [], []>} : vector<8x8xf32>, vector<8x32xf32>, vector<8x32xf32> -> vector<8x32xf32>
    %29 = vector.broadcast %8 : vector<1x32xf32> to vector<8x32xf32>
    %30 = arith.addf %28, %29 : vector<8x32xf32>
    %31 = arith.mulf %30, %30 : vector<8x32xf32>
    %cst_17 = arith.constant 0.000000e+00 : f32
    %32 = vector.broadcast %cst_17 : f32 to vector<8x32xf32>
    %33 = arith.subf %32, %31 : vector<8x32xf32>
    %34 = math.exp %33 : vector<8x32xf32>
    %cst_18 = arith.constant dense<0.000000e+00> : vector<8x16xf32>
    %35 = tpu.matmul %34, %5, %cst_18 {dimension_numbers = #tpu.dot_dimension_numbers<[1], [0], [0], [1], [0, 0, 1, 1], [], []>} : vector<8x32xf32>, vector<32x16xf32>, vector<8x16xf32> -> vector<8x16xf32>
    %36 = vector.broadcast %9 : vector<1x16xf32> to vector<8x16xf32>
    %37 = arith.addf %35, %36 : vector<8x16xf32>
    %38 = arith.negf %37 : vector<8x16xf32>
    %39 = math.exp %38 : vector<8x16xf32>
    %cst_19 = arith.constant 1.000000e+00 : f32
    %40 = vector.broadcast %cst_19 : f32 to vector<8x16xf32>
    %41 = arith.addf %40, %39 : vector<8x16xf32>
    %42 = arith.divf %40, %41 : vector<8x16xf32>
    %c0_20 = arith.constant 0 : index
    %c0_21 = arith.constant 0 : index
    %43 = vector.load %arg8[%c0_20, %c0_21] : memref<8x16xf32, #tpu.memory_space<vmem>>, vector<8x16xf32>
    tpu.vector_store %arg8[%c0_20, %c0_21], %42 {strides = array<i32>} : memref<8x16xf32, #tpu.memory_space<vmem>>, vector<8x16xf32>,
    %c0_22 = arith.constant 0 : index
    %c0_23 = arith.constant 0 : index
    %44 = vector.load %arg9[%c0_22, %c0_23] : memref<8x8xf32, #tpu.memory_space<vmem>>, vector<8x8xf32>
    tpu.vector_store %arg9[%c0_22, %c0_23], %27 {strides = array<i32>} : memref<8x8xf32, #tpu.memory_space<vmem>>, vector<8x8xf32>,
    %c0_24 = arith.constant 0 : index
    %c0_25 = arith.constant 0 : index
    %45 = vector.load %arg10[%c0_24, %c0_25] : memref<8x8xf32, #tpu.memory_space<vmem>>, vector<8x8xf32>
    tpu.vector_store %arg10[%c0_24, %c0_25], %20 {strides = array<i32>} : memref<8x8xf32, #tpu.memory_space<vmem>>, vector<8x8xf32>,
    %c0_26 = arith.constant 0 : index
    %c0_27 = arith.constant 0 : index
    %46 = vector.load %arg11[%c0_26, %c0_27] : memref<8x8xf32, #tpu.memory_space<vmem>>, vector<8x8xf32>
    tpu.vector_store %arg11[%c0_26, %c0_27], %25 {strides = array<i32>} : memref<8x8xf32, #tpu.memory_space<vmem>>, vector<8x8xf32>,
    %c0_28 = arith.constant 0 : index
    %c0_29 = arith.constant 0 : index
    %47 = vector.load %arg12[%c0_28, %c0_29] : memref<8x8xf32, #tpu.memory_space<vmem>>, vector<8x8xf32>
    tpu.vector_store %arg12[%c0_28, %c0_29], %21 {strides = array<i32>} : memref<8x8xf32, #tpu.memory_space<vmem>>, vector<8x8xf32>,
    %c0_30 = arith.constant 0 : index
    %c0_31 = arith.constant 0 : index
    %48 = vector.load %arg4[%c0_30, %c0_31] : memref<8x24xf32, #tpu.memory_space<vmem>>, vector<8x24xf32>
    %c0_32 = arith.constant 0 : index
    %c0_33 = arith.constant 0 : index
    %49 = vector.load %arg5[%c0_32, %c0_33] : memref<8x12xf32, #tpu.memory_space<vmem>>, vector<8x12xf32>
    %c0_34 = arith.constant 0 : index
    %c0_35 = arith.constant 0 : index
    %50 = vector.load %arg6[%c0_34, %c0_35] : memref<120x40xf32, #tpu.memory_space<vmem>>, vector<24x40xf32>
    %c24 = arith.constant 24 : index
    %c0_36 = arith.constant 0 : index
    %51 = vector.load %arg6[%c24, %c0_36] : memref<120x40xf32, #tpu.memory_space<vmem>>, vector<40x24xf32>
    %c64 = arith.constant 64 : index
    %c0_37 = arith.constant 0 : index
    %52 = vector.load %arg6[%c64, %c0_37] : memref<120x40xf32, #tpu.memory_space<vmem>>, vector<12x40xf32>
    %c80 = arith.constant 80 : index
    %c0_38 = arith.constant 0 : index
    %53 = vector.load %arg6[%c80, %c0_38] : memref<120x40xf32, #tpu.memory_space<vmem>>, vector<40x24xf32>
    %c0_39 = arith.constant 0 : index
    %c0_40 = arith.constant 0 : index
    %54 = vector.load %arg7[%c0_39, %c0_40] : memref<8x40xf32, #tpu.memory_space<vmem>>, vector<1x40xf32>
    %c1_41 = arith.constant 1 : index
    %c0_42 = arith.constant 0 : index
    %55 = vector.load %arg7[%c1_41, %c0_42] : memref<8x40xf32, #tpu.memory_space<vmem>>, vector<1x24xf32>
    %c2_43 = arith.constant 2 : index
    %c0_44 = arith.constant 0 : index
    %56 = vector.load %arg7[%c2_43, %c0_44] : memref<8x40xf32, #tpu.memory_space<vmem>>, vector<1x40xf32>
    %c3_45 = arith.constant 3 : index
    %c0_46 = arith.constant 0 : index
    %57 = vector.load %arg7[%c3_45, %c0_46] : memref<8x40xf32, #tpu.memory_space<vmem>>, vector<1x24xf32>
    %cst_47 = arith.constant dense<0.000000e+00> : vector<8x40xf32>
    %58 = tpu.matmul %48, %50, %cst_47 {dimension_numbers = #tpu.dot_dimension_numbers<[1], [0], [0], [1], [0, 0, 1, 1], [], []>} : vector<8x24xf32>, vector<24x40xf32>, vector<8x40xf32> -> vector<8x40xf32>
    %59 = vector.broadcast %54 : vector<1x40xf32> to vector<8x40xf32>
    %60 = arith.addf %58, %59 : vector<8x40xf32>
    %61 = arith.mulf %60, %60 : vector<8x40xf32>
    %cst_48 = arith.constant 0.000000e+00 : f32
    %62 = vector.broadcast %cst_48 : f32 to vector<8x40xf32>
    %63 = arith.subf %62, %61 : vector<8x40xf32>
    %64 = math.exp %63 : vector<8x40xf32>
    %cst_49 = arith.constant dense<0.000000e+00> : vector<8x24xf32>
    %65 = tpu.matmul %64, %51, %cst_49 {dimension_numbers = #tpu.dot_dimension_numbers<[1], [0], [0], [1], [0, 0, 1, 1], [], []>} : vector<8x40xf32>, vector<40x24xf32>, vector<8x24xf32> -> vector<8x24xf32>
    %66 = vector.broadcast %55 : vector<1x24xf32> to vector<8x24xf32>
    %67 = arith.addf %65, %66 : vector<8x24xf32>
    %68 = vector.extract_strided_slice %67 {offsets = [0, 0], sizes = [8, 12], strides = [1, 1]} : vector<8x24xf32> to vector<8x12xf32>
    %69 = vector.extract_strided_slice %67 {offsets = [0, 12], sizes = [8, 12], strides = [1, 1]} : vector<8x24xf32> to vector<8x12xf32>
    %cst_50 = arith.constant 5.000000e-01 : f32
    %70 = vector.broadcast %cst_50 : f32 to vector<8x12xf32>
    %71 = arith.mulf %70, %69 : vector<8x12xf32>
    %72 = math.exp %71 : vector<8x12xf32>
    %73 = arith.mulf %72, %72 : vector<8x12xf32>
    %74 = arith.mulf %72, %49 : vector<8x12xf32>
    %75 = arith.addf %68, %74 : vector<8x12xf32>
    %cst_51 = arith.constant dense<0.000000e+00> : vector<8x40xf32>
    %76 = tpu.matmul %75, %52, %cst_51 {dimension_numbers = #tpu.dot_dimension_numbers<[1], [0], [0], [1], [0, 0, 1, 1], [], []>} : vector<8x12xf32>, vector<12x40xf32>, vector<8x40xf32> -> vector<8x40xf32>
    %77 = vector.broadcast %56 : vector<1x40xf32> to vector<8x40xf32>
    %78 = arith.addf %76, %77 : vector<8x40xf32>
    %79 = arith.mulf %78, %78 : vector<8x40xf32>
    %cst_52 = arith.constant 0.000000e+00 : f32
    %80 = vector.broadcast %cst_52 : f32 to vector<8x40xf32>
    %81 = arith.subf %80, %79 : vector<8x40xf32>
    %82 = math.exp %81 : vector<8x40xf32>
    %cst_53 = arith.constant dense<0.000000e+00> : vector<8x24xf32>
    %83 = tpu.matmul %82, %53, %cst_53 {dimension_numbers = #tpu.dot_dimension_numbers<[1], [0], [0], [1], [0, 0, 1, 1], [], []>} : vector<8x40xf32>, vector<40x24xf32>, vector<8x24xf32> -> vector<8x24xf32>
    %84 = vector.broadcast %57 : vector<1x24xf32> to vector<8x24xf32>
    %85 = arith.addf %83, %84 : vector<8x24xf32>
    %86 = arith.negf %85 : vector<8x24xf32>
    %87 = math.exp %86 : vector<8x24xf32>
    %cst_54 = arith.constant 1.000000e+00 : f32
    %88 = vector.broadcast %cst_54 : f32 to vector<8x24xf32>
    %89 = arith.addf %88, %87 : vector<8x24xf32>
    %90 = arith.divf %88, %89 : vector<8x24xf32>
    %c0_55 = arith.constant 0 : index
    %c0_56 = arith.constant 0 : index
    %91 = vector.load %arg13[%c0_55, %c0_56] : memref<8x24xf32, #tpu.memory_space<vmem>>, vector<8x24xf32>
    tpu.vector_store %arg13[%c0_55, %c0_56], %90 {strides = array<i32>} : memref<8x24xf32, #tpu.memory_space<vmem>>, vector<8x24xf32>,
    %c0_57 = arith.constant 0 : index
    %c0_58 = arith.constant 0 : index
    %92 = vector.load %arg14[%c0_57, %c0_58] : memref<8x12xf32, #tpu.memory_space<vmem>>, vector<8x12xf32>
    tpu.vector_store %arg14[%c0_57, %c0_58], %75 {strides = array<i32>} : memref<8x12xf32, #tpu.memory_space<vmem>>, vector<8x12xf32>,
    %c0_59 = arith.constant 0 : index
    %c0_60 = arith.constant 0 : index
    %93 = vector.load %arg15[%c0_59, %c0_60] : memref<8x12xf32, #tpu.memory_space<vmem>>, vector<8x12xf32>
    tpu.vector_store %arg15[%c0_59, %c0_60], %68 {strides = array<i32>} : memref<8x12xf32, #tpu.memory_space<vmem>>, vector<8x12xf32>,
    %c0_61 = arith.constant 0 : index
    %c0_62 = arith.constant 0 : index
    %94 = vector.load %arg16[%c0_61, %c0_62] : memref<8x12xf32, #tpu.memory_space<vmem>>, vector<8x12xf32>
    tpu.vector_store %arg16[%c0_61, %c0_62], %73 {strides = array<i32>} : memref<8x12xf32, #tpu.memory_space<vmem>>, vector<8x12xf32>,
    %c0_63 = arith.constant 0 : index
    %c0_64 = arith.constant 0 : index
    %95 = vector.load %arg17[%c0_63, %c0_64] : memref<8x12xf32, #tpu.memory_space<vmem>>, vector<8x12xf32>
    tpu.vector_store %arg17[%c0_63, %c0_64], %69 {strides = array<i32>} : memref<8x12xf32, #tpu.memory_space<vmem>>, vector<8x12xf32>,
    return
  }
}

</mosaic_0001>

<bundles_post_ra>
// kernel: tpu_custom_call.1
= control target key start
LH: loop header
LB: loop body
LE: loop exit
PB: predicated region body
PF: predicated region fallthrough
CT: control target
= control target key end

     0   :  { %s1754_s0 = inlined_call_operand.vmem [shape: f32[8,16], index: 0, kind: input, shape index: {}]   ;;  %s1755_s1 = inlined_call_operand.vmem [shape: f32[8,8], index: 1, kind: input, shape index: {}]   ;;  %s1756_s2 = inlined_call_operand.vmem [shape: f32[88,32], index: 2, kind: input, shape index: {}]   ;;  %s1757_s3 = inlined_call_operand.vmem [shape: f32[8,32], index: 3, kind: input, shape index: {}]   ;;  %s1758_s4 = inlined_call_operand.vmem [shape: f32[8,24], index: 4, kind: input, shape index: {}]   ;;  %s1759_s5 = inlined_call_operand.vmem [shape: f32[8,12], index: 5, kind: input, shape index: {}]   ;;  %s1760_s6 = inlined_call_operand.vmem [shape: f32[120,40], index: 6, kind: input, shape index: {}]   ;;  %s1761_s7 = inlined_call_operand.vmem [shape: f32[8,40], index: 7, kind: input, shape index: {}]   ;;  %s1762_s8 = inlined_call_operand.hbm [shape: f32[8,16], index: 8, kind: output, shape index: {0}]   ;;  %s1763_s9 = inlined_call_operand.hbm [shape: f32[8,8], index: 9, kind: output, shape index: {1}]   ;;  %s1764_s10 = inlined_call_operand.hbm [shape: f32[8,8], index: 10, kind: output, shape index: {2}]   ;;  %s1765_s11 = inlined_call_operand.hbm [shape: f32[8,8], index: 11, kind: output, shape index: {3}]   ;;  %s1766_s12 = inlined_call_operand.hbm [shape: f32[8,8], index: 12, kind: output, shape index: {4}]   ;;  %s1767_s13 = inlined_call_operand.hbm [shape: f32[8,24], index: 13, kind: output, shape index: {5}]   ;;  %s1768_s14 = inlined_call_operand.hbm [shape: f32[8,12], index: 14, kind: output, shape index: {6}]   ;;  %s1769_s15 = inlined_call_operand.hbm [shape: f32[8,12], index: 15, kind: output, shape index: {7}]   ;;  %s1770_s16 = inlined_call_operand.hbm [shape: f32[8,12], index: 16, kind: output, shape index: {8}]   ;;  %s1771_s17 = inlined_call_operand.hbm [shape: f32[8,12], index: 17, kind: output, shape index: {9}]  }
   0x1   :  { %1772 = sst [smem:[#allocation24_spill]] %s1754_s0 }
   0x2   :  { %1773 = sst [smem:[#allocation25_spill]] %s1755_s1 }
   0x3   :  { %23 = vsyncpa [#allocation3], 0 }
   0x4   :  { %24 = vsyncpa [#allocation5], 0 }
   0x5   :  { %25 = vsyncpa [#allocation8], 0 }
   0x6   :  { %26 = vsyncpa [#allocation11], 0 }
   0x7   :  { %27 = vsyncpa [#allocation14], 0  ;;  %v47_v0 = vld [vmem:[%s1756_s2] sm:$0xff]  ;;  %v48_v1 = vld [vmem:[%s1756_s2 + $0x8] sm:$0xff]  ;;  %v1360_v2 = vmov 0.0|0.0   ;;  %vm1361_vm0 = vmmov 0  }
   0x8   :  { %1056 = vmatprep.subr.bf16.mxu1 %v1360_v2  ;;  %v1057_v3 = vpack.c.bf16 %v48_v1, %v47_v0  ;;  %v1362_v4 = vmov 0.0  }
   0x9   :  { %984 = vmatprep.mubr.msk.f32.mxu1 %vm1361_vm0, %v1362_v4 }
   0xa   :  { %28 = vsyncpa [#allocation17], 0  ;;  %998 = vmatprep.subr.mxu0 %v1362_v4  ;;  %1000 = vmatprep.mubr.msk.f32.mxu0 %vm1361_vm0, %v1362_v4  ;;  %s1774_s0 = sld [smem:[#allocation24_spill]]  ;;  %vm66_vm1 = vcmask 130048   ;;  %v49_v6 = vld [vmem:[%s1756_s2 + $0x10] sm:$0xff]  ;;  %v50_v7 = vld [vmem:[%s1756_s2 + $0x18] sm:$0xff] }
   0xb   :  { %1058 = vmatpush3.bf16.msra.mxu1 %v1057_v3  ;;  %v51_v8 = vld [vmem:[%s1756_s2 + $0x20] sm:$0xff]  ;;  %v1060_v9 = vpack.c.bf16 %v50_v7, %v49_v6  ;;  %v52_v10 = vld [vmem:[%s1756_s2 + $0x28] sm:$0xff]  ;;  %s1775_s26 = sld [smem:[#allocation25_spill]]  ;;  %s1363_s27 = smov 8   ;;  %vm148_vm2 = vcmask 261120   ;;  %v418_v24 = vld [vmem:[%s1760_s6 + $0x10] sm:$0xff] }
   0xc   :  { %1059 = vmatprep.subr.bf16.mxu1 %v1360_v2  ;;  %v1063_v11 = vpack.c.bf16 %v52_v10, %v51_v8  ;;  %v927_v13 = vld [vmem:[%s1757_s3] ss:$0 sm:$0xff]  ;;  %v417_v21 = vld [vmem:[%s1760_s6 + $0x8] sm:$0xff]  ;;  %vm439_vm3 = vcmask 195584   ;;  %v419_v26 = vld [vmem:[%s1760_s6 + $0x18] sm:$0xff]  ;;  %vm240_vm4 = vcmask 64512  }
   0xd   :  { %v416_v20 = vld [vmem:[%s1760_s6] sm:$0xff]  ;;  %v421_v29 = vld [vmem:[%s1760_s6 + $0x28] sm:$0xff]  ;;  %v422_v30 = vld [vmem:[%s1760_s6 + $0x30] sm:$0xff]  ;;  %s1364_s25 = smov 12   ;;  %vm521_vm5 = vcmask 326656   ;;  %vm613_vm6 = vcmask 97280  }
   0xe   :  { %v1072_v22 = vpack.c.bf16 %v417_v21, %v416_v20  ;;  %v414_v25 = vld [vmem:[%s1758_s4] sm:$0xff]  ;;  %v1078_v31 = vpack.c.bf16 %v422_v30, %v421_v29  ;;  %v423_v32 = vld [vmem:[%s1760_s6 + $0x38] sm:$0xff]  ;;  %v53_v43 = vld [vmem:[%s1756_s2 + $0x30] sm:$0xff]  ;;  %vm617_vm7 = vcmask 1043456   ;;  %vm1367_vm8 = vmmov 1   ;;  %s1369_s22 = smov [#allocation7]  }
   0xf   :  { %v420_v27 = vld [vmem:[%s1760_s6 + $0x20] sm:$0xff]  ;;  %999 = vmatpush3.msra.mxu0 %v53_v43  ;;  %v54_v56 = vld [vmem:[%s1756_s2 + $0x38] sm:$0xff]  ;;  %v56_v58 = vld [vmem:[%s1756_s2 + $0x48] sm:$0xff]  ;;  %s827_s23 = sshll.u32 %s1369_s22, 4  ;;  %s828_s23 = int_to_ptr.vmem [resolvable:$true] %s827_s23 }
  0x10   :  { %v45_v5 = vld [vmem:[%s1774_s0] sm:$0xff]  ;;  %v1075_v28 = vpack.c.bf16 %v420_v27, %v419_v26  ;;  %1065 = vmatprep.subr.bf16.mxu0 %v1360_v2  ;;  %v57_v60 = vld [vmem:[%s1756_s2 + $0x50] sm:$0xff]  ;;  %vm1082_vm9 = vmpackc.low %vm617_vm7, %vm1367_vm8 }
  0x11   :  { %985 = vmatmul.mubr.msk.f32.vlgmr.msra.gmra.mrb[0].mxu1 %vm66_vm1, %v45_v5  ;;  %v46_v12 = vld [vmem:[%s1775_s26] sm:$0xff]  ;;  %s1365_s26 = smov 120   ;;  %v1069_v61 = vpack.c.bf16 %v57_v60, %v56_v58  ;;  %v426_v26 = vld [vmem:[%s1760_s6 + $0x50] sm:$0xff]  ;;  %v427_v27 = vld [vmem:[%s1760_s6 + $0x58] sm:$0xff] }
  0x12   :  { %995 = vmatprep.mubr.msk.f32.mxu1 %vm1361_vm0, %v1362_v4  ;;  %1061 = vmatpush3.bf16.msra.mxu1 %v1060_v9  ;;  %v929_v33 = vld [vmem:[%s1757_s3 + $0x1] ss:$0 sm:$0xff]  ;;  %v936_v38 = vld [vmem:[%s1761_s7] ss:$0 sm:$0xff]  ;;  %v931_v10 = vld [vmem:[%s1757_s3 + $0x2] ss:$0 sm:$0xff] }
  0x13   :  { %1062 = vmatprep.subr.bf16.mxu1 %v1360_v2  ;;  %227 = vrot.lane.b32.xlu0 %v46_v12, %s1363_s27  ;;  %v415_v46 = vld [vmem:[%s1759_s5] sm:$0xff]  ;;  %v429_v30 = vld [vmem:[%s1760_s6 + $0x68] sm:$0xff] }
  0x14   :  { %600 = vrot.lane.b32.xlu1 %v415_v46, %s1364_s25  ;;  %v55_v57 = vld [vmem:[%s1756_s2 + $0x40] sm:$0xff]  ;;  %s1366_s2 = smov 116  }
  0x15   :  { %v1066_v59 = vpack.c.bf16 %v55_v57, %v54_v56  ;;  %v938_v62 = vld [vmem:[%s1761_s7 + $0x1] ss:$0 sm:$0xff] }
  0x16   :  { %1064 = vmatpush3.bf16.msra.mxu1 %v1063_v11  ;;  %v428_v29 = vld [vmem:[%s1760_s6 + $0x60] sm:$0xff] }
  0x17   :  { %1071 = vmatprep.subr.bf16.mxu1 %v1360_v2 }
  0x85   :  { %v228_v48 = vpop.permute.xlu0 %227 }
  0x86   :  { %v601_v6 = vpop.permute.xlu1 %600 }
  0xe4   :  { %v136_v14 = vpop.f32.mrb[0].mxu1 }
  0xe5   :  { %v137_v15 = vadd.f32 %v927_v13, %v136_v14  ;;  %v986_v16 = vpop.f32.mrb[1].mxu1 }
  0xe7   :  { %v140_v17 = vmul.f32 %v137_v15, %v137_v15 }
  0xe9   :  { %v141_v18 = vsub.f32 0.0, %v140_v17  ;;  %v424_v17 = vld [vmem:[%s1760_s6 + $0x40] sm:$0xff] }
  0xeb   :  { %v142_v19 = vmul.f32 1.442695, %v141_v18  ;;  %v425_v18 = vld [vmem:[%s1760_s6 + $0x48] sm:$0xf] }
  0xed   :  { %1108 = vpow2.f32 %v142_v19  ;;  %v1081_v19 = vpack.c.bf16 %v425_v18, %v424_v17 }
  0xf7   :  { %v1109_v23 = vpop.eup %1108 }
  0xf8   :  { %996 = vmatmul.mubr.msk.f32.vlgmr.msra.gmra.mrb[2].mxu1 %vm148_vm2, %v1109_v23 }
  0xf9   :  { %1073 = vmatpush3.bf16.msra.mxu1 %v1072_v22  ;;  %1020 = vmatprep.mubr.msk.f32.mxu1 %vm1361_vm0, %v1362_v4 }
  0xfa   :  { %1018 = vmatprep.subr.mxu1 %v1362_v4 }
  0xfd   :  { %1019 = vmatpush3.msra.mxu1 %v418_v24 }
  0xfe   :  { %1021 = vmatmul.mubr.msk.f32.vlgmr.msra.gmra.mrb[4].mxu1 %vm439_vm3, %v414_v25  ;;  %1074 = vmatprep.subr.bf16.mxu1 %v1360_v2 }
  0xff   :  { %1033 = vmatprep.mubr.msk.f32.mxu1 %vm1361_vm0, %v1362_v4  ;;  %1076 = vmatpush3.bf16.msra.mxu1 %v1075_v28  ;;  %v1085_v28 = vpack.c.bf16 %v427_v27, %v426_v26 }
 0x100   :  { %1077 = vmatprep.subr.bf16.mxu1 %v1360_v2 }
 0x103   :  { %1079 = vmatpush3.bf16.msra.mxu1 %v1078_v31  ;;  %v1088_v31 = vpack.c.bf16 %v429_v30, %v428_v29 }
 0x104   :  { %1031 = vmatprep.subr.mxu1 %v1362_v4 }
 0x107   :  { %1032 = vmatpush3.msra.mxu1 %v423_v32  ;;  %v430_v32 = vld [vmem:[%s1760_s6 + $0x70] sm:$0xff] }
 0x1cb   :  { %v218_v34 = vpop.f32.mrb[2].mxu1 }
 0x1cc   :  { %v219_v35 = vadd.f32 %v929_v33, %v218_v34  ;;  %v997_v36 = vpop.f32.mrb[3].mxu1 }
 0x1ce   :  { %v222_v37 = vmul.f32 0.5, %v219_v35  ;;  %403 = vst.msk [vmem:[#allocation6] sm:$0xff] %vm240_vm4, %v219_v35 }
 0x1d0   :  { %v223_v39 = vmul.f32 1.442695, %v222_v37  ;;  %v940_v37 = vld [vmem:[%s1761_s7 + $0x2] ss:$0 sm:$0xff] }
 0x1d1   :  { %v509_v40 = vpop.f32.mrb[4].mxu1 }
 0x1d2   :  { %1110 = vpow2.f32 %v223_v39  ;;  %v510_v41 = vadd.f32 %v936_v38, %v509_v40  ;;  %v1022_v42 = vpop.f32.mrb[5].mxu1 }
 0x1d4   :  { %v513_v44 = vmul.f32 %v510_v41, %v510_v41 }
 0x1d6   :  { %v514_v45 = vsub.f32 0.0, %v513_v44 }
 0x1d8   :  { %v515_v47 = vmul.f32 1.442695, %v514_v45 }
 0x1da   :  { %1112 = vpow2.f32 %v515_v47 }
 0x1dc   :  { %v1111_v49 = vpop.eup %1110 }
 0x1dd   :  { %v230_v50 = vmul.f32 %v1111_v49, %v228_v48  ;;  %v225_v51 = vmul.f32 %v1111_v49, %v1111_v49 }
 0x1df   :  { %232 = vrot.lane.b32.xlu0 %v230_v50, %s1365_s26 }
 0x1e3   :  { %405 = vrot.lane.b32.xlu0 %v225_v51, %s1365_s26 }
 0x1e4   :  { %v1113_v52 = vpop.eup %1112 }
 0x1e5   :  { %1034 = vmatmul.mubr.msk.f32.vlgmr.msra.gmra.mrb[6].mxu1 %vm521_vm5, %v1113_v52 }
 0x251   :  { %v233_v53 = vpop.permute.xlu0 %232 }
 0x252   :  { %v235_v54 = vadd.f32 %v233_v53, %v219_v35 }
 0x254   :  { %1001 = vmatmul.mubr.msk.f32.vlgmr.msra.gmra.mrb[0].mxu0 %vm240_vm4, %v235_v54  ;;  %402 = vst.msk [vmem:[#allocation4] sm:$0xff] %vm240_vm4, %v235_v54 }
 0x255   :  { %v406_v55 = vpop.permute.xlu0 %405  ;;  %1011 = vmatprep.mubr.msk.f32.mxu0 %vm1361_vm0, %v1362_v4  ;;  %1067 = vmatpush3.bf16.msra.mxu0 %v1066_v59 }
 0x256   :  { %408 = vst.msk [vmem:[#allocation7] sm:$0xff] %vm240_vm4, %v406_v55  ;;  %1068 = vmatprep.subr.bf16.mxu0 %v1360_v2 }
 0x259   :  { %1070 = vmatpush3.bf16.msra.mxu0 %v1069_v61 }
 0x25a   :  { %1080 = vmatprep.subr.bf16.mxu0 %v1360_v2 }
 0x2b8   :  { %v591_v63 = vpop.f32.mrb[6].mxu1 }
 0x2b9   :  { %v592_v0 = vadd.f32 %v938_v62, %v591_v63  ;;  %v1035_v1 = vpop.f32.mrb[7].mxu1 }
 0x2bb   :  { %v595_v3 = vmul.f32 0.5, %v592_v0  ;;  %780 = vst.msk [vmem:[#allocation13] sm:$0xff] %vm613_vm6, %v592_v0 }
 0x2bd   :  { %v596_v5 = vmul.f32 1.442695, %v595_v3 }
 0x2bf   :  { %1114 = vpow2.f32 %v596_v5 }
 0x2c9   :  { %v1115_v7 = vpop.eup %1114 }
 0x2ca   :  { %v603_v8 = vmul.f32 %v1115_v7, %v601_v6  ;;  %v598_v9 = vmul.f32 %v1115_v7, %v1115_v7 }
 0x2cc   :  { %605 = vrot.lane.b32.xlu1 %v603_v8, %s1366_s2  ;;  %782 = vrot.lane.b32.xlu0 %v598_v9, %s1366_s2 }
 0x2d0   :  { %410 = vrot.lane.b32.xlu1 %v219_v35, %s1365_s26 }
 0x2d4   :  { %787 = vrot.lane.b32.xlu1 %v592_v0, %s1366_s2 }
 0x327   :  { %v310_v11 = vpop.f32.mrb[0].mxu0 }
 0x328   :  { %v311_v12 = vadd.f32 %v931_v10, %v310_v11  ;;  %v1002_v13 = vpop.f32.mrb[1].mxu0 }
 0x32a   :  { %v314_v14 = vmul.f32 %v311_v12, %v311_v12 }
 0x32c   :  { %v315_v15 = vsub.f32 0.0, %v314_v14 }
 0x32e   :  { %v316_v16 = vmul.f32 1.442695, %v315_v15 }
 0x330   :  { %1116 = vpow2.f32 %v316_v16 }
 0x33a   :  { %v1117_v20 = vpop.eup %1116 }
 0x33b   :  { %1012 = vmatmul.mubr.msk.f32.vlgmr.msra.gmra.mrb[2].mxu0 %vm148_vm2, %v1117_v20 }
 0x33c   :  { %1083 = vmatpush3.bf16.msk.msra.mxu0 %vm1082_vm9, %v1081_v19  ;;  %1040 = vmatprep.mubr.msk.f32.mxu0 %vm1361_vm0, %v1362_v4 }
 0x33d   :  { %1084 = vmatprep.subr.bf16.mxu0 %v1360_v2 }
 0x33e   :  { %v606_v21 = vpop.permute.xlu1 %605  ;;  %v783_v22 = vpop.permute.xlu0 %782 }
 0x33f   :  { %v608_v23 = vadd.f32 %v606_v21, %v592_v0  ;;  %785 = vst.msk [vmem:[#allocation15] sm:$0xff] %vm613_vm6, %v783_v22 }
 0x341   :  { %779 = vst.msk [vmem:[#allocation12] sm:$0xff] %vm613_vm6, %v608_v23  ;;  %1041 = vmatmul.mubr.msk.f32.vlgmr.msra.gmra.mrb[4].mxu0 %vm613_vm6, %v608_v23 }
 0x342   :  { %v411_v24 = vpop.permute.xlu1 %410  ;;  %1053 = vmatprep.mubr.msk.f32.mxu0 %vm1361_vm0, %v1362_v4  ;;  %1086 = vmatpush3.bf16.msra.mxu0 %v1085_v28 }
 0x343   :  { %413 = vst.msk [vmem:[#allocation9] sm:$0xff] %vm240_vm4, %v411_v24  ;;  %1087 = vmatprep.subr.bf16.mxu0 %v1360_v2  ;;  %v933_v2 = vld [vmem:[%s1757_s3 + $0x3] ss:$0 sm:$0xff]  ;;  %s1368_s3 = smov [#allocation4]  }
 0x344   :  { %s807_s6 = sshll.u32 %s1368_s3, 4  ;;  %s808_s6 = int_to_ptr.vmem [resolvable:$true] %s807_s6 }
 0x345   :  { %s1128_s24 = scalar_lea.vmem %s808_s6, 128  ;;  %p1133_p1 = scmp.lt.s32.totalorder %s808_s6, %s808_s6 }
 0x346   :  { %v788_v25 = vpop.permute.xlu1 %787  ;;  %1089 = vmatpush3.bf16.msra.mxu0 %v1088_v31  ;;  %p1129_p0 = scmp.ne.s32.totalorder %s808_s6, %s1128_s24  ;;  %p1134_p2 = scmp.lt.s32.totalorder %s1128_s24, %s1128_s24 }
 0x347   :  { %790 = vst.msk [vmem:[#allocation16] sm:$0xff] %vm613_vm6, %v788_v25  ;;  %1051 = vmatprep.subr.mxu0 %v1362_v4 }
 0x348   :  { %p1135_p3 = por %p1134_p2, %p1133_p1 }
 0x34a   :  { %1052 = vmatpush3.msra.mxu0 %v430_v32  ;;  %p1136_p4 = pnand %p1135_p3, %p1129_p0 }
 0x40e   :  { %v391_v33 = vpop.f32.mrb[2].mxu0 }
 0x40f   :  { %v392_v34 = vadd.f32 %v933_v2, %v391_v33  ;;  %v1013_v35 = vpop.f32.mrb[3].mxu0 }
 0x411   :  { %v935_v36 = vmul.f32 -1.442695, %v392_v34 }
 0x413   :  { %1118 = vpow2.f32 %v935_v36 }
 0x414   :  { %v687_v38 = vpop.f32.mrb[4].mxu0 }
 0x415   :  { %v688_v4 = vadd.f32 %v940_v37, %v687_v38  ;;  %v1042_v39 = vpop.f32.mrb[5].mxu0 }
 0x417   :  { %v691_v40 = vmul.f32 %v688_v4, %v688_v4 }
 0x419   :  { %v692_v41 = vsub.f32 0.0, %v691_v40 }
 0x41b   :  { %v693_v42 = vmul.f32 1.442695, %v692_v41 }
 0x41d   :  { %v1119_v43 = vpop.eup %1118  ;;  %1120 = vpow2.f32 %v693_v42 }
 0x41e   :  { %v398_v44 = vadd.f32 1.0, %v1119_v43 }
 0x420   :  { %1122 = vrcp.f32 %v398_v44 }
 0x427   :  { %v1121_v45 = vpop.eup %1120 }
 0x428   :  { %1054 = vmatmul.mubr.msk.f32.vlgmr.msra.gmra.mrb[6].mxu0 %vm521_vm5, %v1121_v45 }
 0x42a   :  { %v1123_v46 = vpop.eup %1122 }
 0x42b   :  { %401 = vst.msk [vmem:[#allocation2] sm:$0xff] %vm66_vm1, %v1123_v46 }
 0x42c   :  { %1139 = shalt.err (!%p1136_p4)
}
 0x42d   :  { %s1140_s5 = scalar_lea.hbm %s1763_s9, 128 }
 0x42e   :  { %p1141_p5 = scmp.ne.s32.totalorder %s1763_s9, %s1140_s5  ;;  %p1144_p6 = scmp.lt.u32.totalorder %s1140_s5, %s1763_s9 }
 0x430   :  { %p1146_p7 = pnand %p1144_p6, %p1141_p5 }
 0x432   :  { %1149 = shalt.err (!%p1146_p7)
}
 0x433   :  { %810 = dma.vmem_to_hbm [thread:$0]  %s808_s6, 128, %s1763_s9, [#allocation5]  }
 0x434   :  { %s1150_s18 = scalar_lea.vmem %s828_s23, 128  ;;  %p1155_p9 = scmp.lt.s32.totalorder %s828_s23, %s828_s23 }
 0x435   :  { %p1151_p8 = scmp.ne.s32.totalorder %s828_s23, %s1150_s18  ;;  %p1156_p10 = scmp.lt.s32.totalorder %s1150_s18, %s1150_s18 }
 0x437   :  { %p1157_p11 = por %p1156_p10, %p1155_p9 }
 0x439   :  { %p1158_p12 = pnand %p1157_p11, %p1151_p8 }
 0x43b   :  { %1161 = shalt.err (!%p1158_p12)
}
 0x43c   :  { %s1162_s2 = scalar_lea.hbm %s1765_s11, 128 }
 0x43d   :  { %p1163_p13 = scmp.ne.s32.totalorder %s1765_s11, %s1162_s2  ;;  %p1166_p0 = scmp.lt.u32.totalorder %s1162_s2, %s1765_s11 }
 0x43f   :  { %p1168_p1 = pnand %p1166_p0, %p1163_p13 }
 0x441   :  { %1171 = shalt.err (!%p1168_p1)
}
 0x442   :  { %830 = dma.vmem_to_hbm [thread:$0]  %s828_s23, 128, %s1765_s11, [#allocation8]  }
 0x443   :  { %s1370_s24 = smov [#allocation13]  }
 0x444   :  { %s867_s25 = sshll.u32 %s1370_s24, 4  ;;  %s868_s25 = int_to_ptr.vmem [resolvable:$true] %s867_s25 }
 0x445   :  { %s1172_s26 = scalar_lea.vmem %s868_s25, 128  ;;  %p1177_p3 = scmp.lt.s32.totalorder %s868_s25, %s868_s25 }
 0x446   :  { %p1173_p2 = scmp.ne.s32.totalorder %s868_s25, %s1172_s26  ;;  %p1178_p4 = scmp.lt.s32.totalorder %s1172_s26, %s1172_s26 }
 0x448   :  { %p1179_p5 = por %p1178_p4, %p1177_p3 }
 0x44a   :  { %p1180_p6 = pnand %p1179_p5, %p1173_p2 }
 0x44c   :  { %1183 = shalt.err (!%p1180_p6)
}
 0x44d   :  { %s1184_s27 = scalar_lea.hbm %s1769_s15, 128 }
 0x44e   :  { %p1185_p7 = scmp.ne.s32.totalorder %s1769_s15, %s1184_s27  ;;  %p1188_p8 = scmp.lt.u32.totalorder %s1184_s27, %s1769_s15 }
 0x450   :  { %p1190_p9 = pnand %p1188_p8, %p1185_p7 }
 0x452   :  { %1193 = shalt.err (!%p1190_p9)
}
 0x453   :  { %870 = dma.vmem_to_hbm [thread:$0]  %s868_s25, 128, %s1769_s15, [#allocation14]  }
 0x454   :  { %s1371_s18 = smov [#allocation2]   ;;  %s1372_s1 = smov [#allocation6]  }
 0x455   :  { %s797_s19 = sshll.u32 %s1371_s18, 4  ;;  %s817_s2 = sshll.u32 %s1372_s1, 4  ;;  %s798_s19 = int_to_ptr.vmem [resolvable:$true] %s797_s19  ;;  %s818_s2 = int_to_ptr.vmem [resolvable:$true] %s817_s2 }
 0x456   :  { %s1194_s20 = scalar_lea.vmem %s798_s19, 128  ;;  %p1199_p11 = scmp.lt.s32.totalorder %s798_s19, %s798_s19 }
 0x457   :  { %p1195_p10 = scmp.ne.s32.totalorder %s798_s19, %s1194_s20  ;;  %p1200_p12 = scmp.lt.s32.totalorder %s1194_s20, %s1194_s20 }
 0x459   :  { %p1201_p13 = por %p1200_p12, %p1199_p11 }
 0x45b   :  { %p1202_p0 = pnand %p1201_p13, %p1195_p10 }
 0x45d   :  { %1205 = shalt.err (!%p1202_p0)
}
 0x45e   :  { %s1206_s22 = scalar_lea.hbm %s1762_s8, 128 }
 0x45f   :  { %p1207_p1 = scmp.ne.s32.totalorder %s1762_s8, %s1206_s22  ;;  %p1210_p2 = scmp.lt.u32.totalorder %s1206_s22, %s1762_s8 }
 0x461   :  { %p1212_p3 = pnand %p1210_p2, %p1207_p1 }
 0x463   :  { %1215 = shalt.err (!%p1212_p3)
}
 0x464   :  { %800 = dma.vmem_to_hbm [thread:$0]  %s798_s19, 128, %s1762_s8, [#allocation3]  }
 0x465   :  { %s1216_s5 = scalar_lea.vmem %s818_s2, 128  ;;  %p1221_p5 = scmp.lt.s32.totalorder %s818_s2, %s818_s2 }
 0x466   :  { %p1217_p4 = scmp.ne.s32.totalorder %s818_s2, %s1216_s5  ;;  %p1222_p6 = scmp.lt.s32.totalorder %s1216_s5, %s1216_s5 }
 0x468   :  { %p1223_p7 = por %p1222_p6, %p1221_p5 }
 0x46a   :  { %p1224_p8 = pnand %p1223_p7, %p1217_p4 }
 0x46c   :  { %1227 = shalt.err (!%p1224_p8)
}
 0x46d   :  { %s1228_s28 = scalar_lea.hbm %s1764_s10, 128 }
 0x46e   :  { %p1229_p9 = scmp.ne.s32.totalorder %s1764_s10, %s1228_s28  ;;  %p1232_p10 = scmp.lt.u32.totalorder %s1228_s28, %s1764_s10 }
 0x470   :  { %p1234_p11 = pnand %p1232_p10, %p1229_p9 }
 0x472   :  { %1237 = shalt.err (!%p1234_p11)
}
 0x473   :  { %820 = dma.vmem_to_hbm [thread:$0]  %s818_s2, 128, %s1764_s10, [#allocation5]  }
 0x474   :  { %s1373_s18 = smov [#allocation9]  }
 0x475   :  { %s837_s19 = sshll.u32 %s1373_s18, 4  ;;  %s838_s19 = int_to_ptr.vmem [resolvable:$true] %s837_s19 }
 0x476   :  { %s1238_s1 = scalar_lea.vmem %s838_s19, 128  ;;  %p1243_p13 = scmp.lt.s32.totalorder %s838_s19, %s838_s19 }
 0x477   :  { %p1239_p12 = scmp.ne.s32.totalorder %s838_s19, %s1238_s1  ;;  %p1244_p0 = scmp.lt.s32.totalorder %s1238_s1, %s1238_s1 }
 0x479   :  { %p1245_p1 = por %p1244_p0, %p1243_p13 }
 0x47b   :  { %p1246_p2 = pnand %p1245_p1, %p1239_p12 }
 0x47d   :  { %1249 = shalt.err (!%p1246_p2)
}
 0x47e   :  { %s1250_s3 = scalar_lea.hbm %s1766_s12, 128 }
 0x47f   :  { %p1251_p3 = scmp.ne.s32.totalorder %s1766_s12, %s1250_s3  ;;  %p1254_p4 = scmp.lt.u32.totalorder %s1250_s3, %s1766_s12 }
 0x481   :  { %p1256_p5 = pnand %p1254_p4, %p1251_p3 }
 0x483   :  { %1259 = shalt.err (!%p1256_p5)
}
 0x484   :  { %840 = dma.vmem_to_hbm [thread:$0]  %s838_s19, 128, %s1766_s12, [#allocation8]  }
 0x485   :  { %s1374_s24 = smov [#allocation15]   ;;  %s1375_s26 = smov [#allocation16]  }
 0x486   :  { %s877_s25 = sshll.u32 %s1374_s24, 4  ;;  %s887_s5 = sshll.u32 %s1375_s26, 4  ;;  %s878_s25 = int_to_ptr.vmem [resolvable:$true] %s877_s25  ;;  %s888_s5 = int_to_ptr.vmem [resolvable:$true] %s887_s5 }
 0x487   :  { %s1260_s4 = scalar_lea.vmem %s878_s25, 128  ;;  %p1265_p7 = scmp.lt.s32.totalorder %s878_s25, %s878_s25 }
 0x488   :  { %p1261_p6 = scmp.ne.s32.totalorder %s878_s25, %s1260_s4  ;;  %p1266_p8 = scmp.lt.s32.totalorder %s1260_s4, %s1260_s4 }
 0x48a   :  { %p1267_p9 = por %p1266_p8, %p1265_p7 }
 0x48c   :  { %p1268_p10 = pnand %p1267_p9, %p1261_p6 }
 0x48e   :  { %1271 = shalt.err (!%p1268_p10)
}
 0x48f   :  { %s1272_s29 = scalar_lea.hbm %s1770_s16, 128 }
 0x490   :  { %p1273_p11 = scmp.ne.s32.totalorder %s1770_s16, %s1272_s29  ;;  %p1276_p12 = scmp.lt.u32.totalorder %s1272_s29, %s1770_s16 }
 0x492   :  { %p1278_p13 = pnand %p1276_p12, %p1273_p11 }
 0x494   :  { %1281 = shalt.err (!%p1278_p13)
}
 0x495   :  { %880 = dma.vmem_to_hbm [thread:$0]  %s878_s25, 128, %s1770_s16, [#allocation14]  }
 0x496   :  { %s1282_s18 = scalar_lea.vmem %s888_s5, 128  ;;  %p1287_p1 = scmp.lt.s32.totalorder %s888_s5, %s888_s5 }
 0x497   :  { %p1283_p0 = scmp.ne.s32.totalorder %s888_s5, %s1282_s18  ;;  %p1288_p2 = scmp.lt.s32.totalorder %s1282_s18, %s1282_s18 }
 0x499   :  { %p1289_p3 = por %p1288_p2, %p1287_p1 }
 0x49b   :  { %p1290_p4 = pnand %p1289_p3, %p1283_p0 }
 0x49d   :  { %1293 = shalt.err (!%p1290_p4)
}
 0x49e   :  { %s1294_s20 = scalar_lea.hbm %s1771_s17, 128 }
 0x49f   :  { %p1295_p5 = scmp.ne.s32.totalorder %s1771_s17, %s1294_s20  ;;  %p1298_p6 = scmp.lt.u32.totalorder %s1294_s20, %s1771_s17 }
 0x4a1   :  { %p1300_p7 = pnand %p1298_p6, %p1295_p5 }
 0x4a3   :  { %1303 = shalt.err (!%p1300_p7)
}
 0x4a4   :  { %890 = dma.vmem_to_hbm [thread:$0]  %s888_s5, 128, %s1771_s17, [#allocation17]   ;;  %v943_v47 = vld [vmem:[%s1761_s7 + $0x3] ss:$0 sm:$0xff] }
 0x4a5   :  { %s1376_s15 = smov [#allocation10]   ;;  %s1377_s25 = smov [#allocation12]  }
 0x4a6   :  { %s847_s24 = sshll.u32 %s1376_s15, 4  ;;  %s857_s26 = sshll.u32 %s1377_s25, 4  ;;  %s848_s24 = int_to_ptr.vmem [resolvable:$true] %s847_s24  ;;  %s858_s26 = int_to_ptr.vmem [resolvable:$true] %s857_s26 }
 0x4a7   :  { %s1304_s17 = scalar_lea.vmem %s848_s24, 128  ;;  %p1309_p9 = scmp.lt.s32.totalorder %s848_s24, %s848_s24 }
 0x4a8   :  { %p1305_p8 = scmp.ne.s32.totalorder %s848_s24, %s1304_s17  ;;  %p1310_p10 = scmp.lt.s32.totalorder %s1304_s17, %s1304_s17 }
 0x4aa   :  { %p1311_p11 = por %p1310_p10, %p1309_p9 }
 0x4ac   :  { %p1312_p12 = pnand %p1311_p11, %p1305_p8 }
 0x4fb   :  { %v768_v48 = vpop.f32.mrb[6].mxu0 }
 0x4fc   :  { %v769_v49 = vadd.f32 %v943_v47, %v768_v48  ;;  %v1055_v50 = vpop.f32.mrb[7].mxu0 }
 0x4fe   :  { %v945_v51 = vmul.f32 -1.442695, %v769_v49 }
 0x500   :  { %1124 = vpow2.f32 %v945_v51 }
 0x50a   :  { %v1125_v52 = vpop.eup %1124 }
 0x50b   :  { %v775_v53 = vadd.f32 1.0, %v1125_v52 }
 0x50d   :  { %1126 = vrcp.f32 %v775_v53 }
 0x517   :  { %v1127_v54 = vpop.eup %1126 }
 0x518   :  { %778 = vst.msk [vmem:[#allocation10] sm:$0xff] %vm439_vm3, %v1127_v54 }
 0x519   :  { %1315 = shalt.err (!%p1312_p12)
}
 0x51a   :  { %s1316_s4 = scalar_lea.hbm %s1767_s13, 128 }
 0x51b   :  { %p1317_p13 = scmp.ne.s32.totalorder %s1767_s13, %s1316_s4  ;;  %p1320_p0 = scmp.lt.u32.totalorder %s1316_s4, %s1767_s13 }
 0x51d   :  { %p1322_p1 = pnand %p1320_p0, %p1317_p13 }
 0x51f   :  { %1325 = shalt.err (!%p1322_p1)
}
 0x520   :  { %850 = dma.vmem_to_hbm [thread:$0]  %s848_s24, 128, %s1767_s13, [#allocation11]  }
 0x521   :  { %s1326_s23 = scalar_lea.vmem %s858_s26, 128  ;;  %p1331_p3 = scmp.lt.s32.totalorder %s858_s26, %s858_s26 }
 0x522   :  { %p1327_p2 = scmp.ne.s32.totalorder %s858_s26, %s1326_s23  ;;  %p1332_p4 = scmp.lt.s32.totalorder %s1326_s23, %s1326_s23 }
 0x524   :  { %p1333_p5 = por %p1332_p4, %p1331_p3 }
 0x526   :  { %p1334_p6 = pnand %p1333_p5, %p1327_p2 }
 0x528   :  { %1337 = shalt.err (!%p1334_p6)
}
 0x529   :  { %s1338_s18 = scalar_lea.hbm %s1768_s14, 128 }
 0x52a   :  { %p1339_p7 = scmp.ne.s32.totalorder %s1768_s14, %s1338_s18  ;;  %p1342_p8 = scmp.lt.u32.totalorder %s1338_s18, %s1768_s14 }
 0x52c   :  { %p1344_p9 = pnand %p1342_p8, %p1339_p7 }
 0x52e   :  { %1347 = shalt.err (!%p1344_p9)
}
 0x52f   :  { %860 = dma.vmem_to_hbm [thread:$0]  %s858_s26, 128, %s1768_s14, [#allocation11]  }
 0x530   :  { %1348 = dma.done.wait [#allocation3], 128  }
 0x531   :  { %1349 = vsyncadd [#allocation3], 4294967168 }
 0x532   :  { %1350 = dma.done.wait [#allocation5], 256  }
 0x533   :  { %1351 = vsyncadd [#allocation5], 4294967040 }
 0x534   :  { %1352 = dma.done.wait [#allocation8], 256  }
 0x535   :  { %1353 = vsyncadd [#allocation8], 4294967040 }
 0x536   :  { %1354 = dma.done.wait [#allocation11], 256  }
 0x537   :  { %1355 = vsyncadd [#allocation11], 4294967040 }
 0x538   :  { %1356 = dma.done.wait [#allocation14], 256  }
 0x539   :  { %1357 = vsyncadd [#allocation14], 4294967040 }
 0x53a   :  { %1358 = dma.done.wait [#allocation17], 128  }
 0x53b   :  { %1359 = vsyncadd [#allocation17], 4294967168 }
 0x53c   :  { %921 = vsyncpa [#allocation3], 1 }
 0x53d   :  { %922 = vsyncpa [#allocation5], 1 }
 0x53e   :  { %923 = vsyncpa [#allocation8], 1 }
 0x53f   :  { %924 = vsyncpa [#allocation11], 1 }
 0x540   :  { %925 = vsyncpa [#allocation14], 1 }
 0x541   :  { %926 = vsyncpa [#allocation17], 1 }

</bundles_post_ra>
